<compile_context>
chip_gen: v5e
topology: v5e:2x2
jax: 0.10.0
libtpu: 0.0.40
codegen_flags: <defaults>
</compile_context>

<pallas_src>
import functools

import jax
import jax.numpy as jnp
import numpy as np
from jax.experimental import pallas as pl
from jax.experimental.pallas import tpu as pltpu

EPS = 1e-5  # torch.nn.functional.instance_norm default


def _adain_kernel(ms_ref, x_ref, o_ref, *, b_blk, c_blk, n_grid, c_grid, hw):
    # ms_ref: (N, C, 2) f32, resident in VMEM. lane 0 = AdaIN mean, lane 1 = AdaIN std
    # x_ref:  (b_blk, c_blk, HW) in the source dtype (channels on sublanes, spatial on lanes)
    # o_ref:  (b_blk, c_blk, HW) same dtype as x
    if n_grid == 1:
        nsl = slice(None)                       # static slice when the grid dim is trivial
    else:
        nsl = pl.ds(pl.multiple_of(pl.program_id(0) * b_blk, b_blk), b_blk)
    if c_grid == 1:
        csl = slice(None)
    else:
        # c_blk is a multiple of 8 whenever c_grid > 1 -> sublane-aligned dynamic slice.
        csl = pl.ds(pl.multiple_of(pl.program_id(1) * c_blk, c_blk), c_blk)

    ms = ms_ref[nsl, csl, :]                    # (b_blk, c_blk, 2)
    mean_t = ms[..., 0:1]                       # (b_blk, c_blk, 1)
    std_t = ms[..., 1:2]

    x = x_ref[...].astype(jnp.float32)          # in-register upcast; HBM stays narrow
    inv_hw = 1.0 / hw
    mu = jnp.sum(x, axis=-1, keepdims=True) * inv_hw
    d = x - mu                                  # reused for variance AND output
    var = jnp.sum(d * d, axis=-1, keepdims=True) * inv_hw

    # Fused AdaIN: one per-channel scale (EUP rsqrt), then one mul + one add on the slab.
    scale = jax.lax.rsqrt(var + EPS) * std_t    # (b_blk, c_blk, 1)
    o_ref[...] = (d * scale + mean_t).astype(o_ref.dtype)


def _tpu_params():
    """(target block bytes, vmem_limit cap, TensorCores per device), generation-aware."""
    vmem_cap = 64 << 20                         # conservative fallback = v7x per-TC VMEM
    n_cores = 1
    try:
        vmem_cap = int(pltpu.get_tpu_info().vmem_capacity_bytes)
    except Exception:
        pass
    try:
        kind = jax.devices()[0].device_kind.lower()
        if any(tag in kind for tag in ("v4", "v5p", "v7", "7x")):
            n_cores = 2                         # megacore / dual-TC parts
    except Exception:
        pass
    if vmem_cap <= (64 << 20):                  # v7x-class (or unknown): halved VMEM
        return 6 << 20, 56 << 20, n_cores
    return 12 << 20, 100 << 20, n_cores         # v5e / v6e: 128 MiB physical VMEM


def _choose_blocks(n, c, hw, itemsize, target_bytes, n_cores):
    """Pick (b_blk, c_blk): big blocks to amortize the ~0.35us/step overhead, small
    enough for double-buffered VMEM, keeping >= n_cores grid steps on multi-TC parts."""
    chan_bytes = hw * itemsize

    c_blk = c
    if c * chan_bytes > target_bytes and c % 8 == 0:
        for cb in range(8, c, 8):               # sublane-aligned divisors of C
            if c % cb == 0 and cb * chan_bytes <= target_bytes:
                c_blk = cb                      # largest fitting divisor wins
        if c_blk == c:
            c_blk = 8                           # nothing fit: smallest legal channel tile
        # TODO(synk): if even 8 channels exceed the budget, H*W needs tiling too.

    b_blk = 1
    if c_blk == c:
        for bb in range(2, n + 1):              # fold batch elements into one block
            if n % bb:
                continue
            if bb * c * chan_bytes > target_bytes:
                break
            if n_cores <= 1 or n // bb >= n_cores:
                b_blk = bb
    return b_blk, c_blk


@jax.jit
def adain_pallas(x, mean, std):
    """x: (N, C, H, W); mean/std broadcastable to (N, C, 1, 1)."""
    N, C, H, W = x.shape
    HW = H * W

    # Free reshape: flattened spatial axis on lanes, native dtype end-to-end.
    x2 = x.reshape(N, C, HW)

    # Merge mean/std into one small resident (N, C, 2) f32 array.
    mean_b = jnp.broadcast_to(jnp.asarray(mean, jnp.float32), (N, C, 1, 1)).reshape(N, C, 1)
    std_b = jnp.broadcast_to(jnp.asarray(std, jnp.float32), (N, C, 1, 1)).reshape(N, C, 1)
    ms = jnp.concatenate([mean_b, std_b], axis=-1)              # (N, C, 2)

    itemsize = jnp.dtype(x.dtype).itemsize
    target_bytes, vmem_cap_limit, n_cores = _tpu_params()
    b_blk, c_blk = _choose_blocks(N, C, HW, itemsize, target_bytes, n_cores)
    n_grid, c_grid = N // b_blk, C // c_blk
    grid = (n_grid, c_grid)

    # Double-buffered in block + double-buffered out block + resident ms + slack.
    blk_bytes = b_blk * c_blk * HW * itemsize
    ms_bytes = N * ((C + 7) // 8) * 8 * 128 * 4                 # lane/sublane-padded
    need = 4 * blk_bytes + ms_bytes + (1 << 20)
    vmem_bytes = int(min(max(need, 32 << 20), vmem_cap_limit))
    if need > vmem_bytes:
        vmem_bytes = int(need)  # untileable-C fallback; request what is actually needed

    kernel = functools.partial(
        _adain_kernel, b_blk=b_blk, c_blk=c_blk, n_grid=n_grid, c_grid=c_grid, hw=HW
    )

    out = pl.pallas_call(
        kernel,
        out_shape=jax.ShapeDtypeStruct((N, C, HW), x.dtype),
        grid_spec=pltpu.PrefetchScalarGridSpec(
            num_scalar_prefetch=0,
            grid=grid,
            in_specs=[
                # Resident mean/std: constant block index -> DMA'd once, reused every step.
                pl.BlockSpec((N, C, 2), lambda n, c: (0, 0, 0)),
                pl.BlockSpec((b_blk, c_blk, HW), lambda n, c: (n, c, 0)),
            ],
            out_specs=pl.BlockSpec((b_blk, c_blk, HW), lambda n, c: (n, c, 0)),
        ),
        compiler_params=pltpu.CompilerParams(
            dimension_semantics=("parallel", "parallel"),
            vmem_limit_bytes=vmem_bytes,
        ),
    )(ms, x2)

    return out.reshape(N, C, H, W)


def adain_reference(x, mean, std):
    """Pure-JAX reference mirroring torch.nn.functional.instance_norm + AdaIN."""
    xf = x.astype(jnp.float32)
    mu = xf.mean(axis=(2, 3), keepdims=True)
    var = ((xf - mu) ** 2).mean(axis=(2, 3), keepdims=True)
    xhat = (xf - mu) / jnp.sqrt(var + EPS)
    return (xhat * std + mean).astype(x.dtype)


if __name__ == "__main__":
    N, C, H, W = 2, 4, 16, 16

    key = jax.random.PRNGKey(0)
    kx, km, ks = jax.random.split(key, 3)

    x = jax.random.normal(kx, (N, C, H, W), dtype=jnp.float32)
    mean = jax.random.normal(km, (N, C, 1, 1), dtype=jnp.float32)
    std = jax.random.uniform(ks, (N, C, 1, 1), dtype=jnp.float32,
                             minval=0.5, maxval=1.5)

    out = adain_pallas(x, mean, std)
    jax.block_until_ready(out)

    ref = adain_reference(x, mean, std)
    np.testing.assert_allclose(np.asarray(out), np.asarray(ref),
                               rtol=1e-4, atol=1e-4)

    print("KERNEL_OK")
</pallas_src>

<mosaic_0001>
module attributes {stable_mosaic.version = 11 : i64} {
  func.func @_adain_kernel(%arg0: i32, %arg1: i32, %arg2: memref<2x4x2xf32, #tpu.memory_space<vmem>>, %arg3: memref<2x4x256xf32, #tpu.memory_space<vmem>>, %arg4: memref<2x4x256xf32, #tpu.memory_space<vmem>>) attributes {dimension_semantics = [#tpu.dimension_semantics<parallel>, #tpu.dimension_semantics<parallel>], iteration_bounds = array<i64: 1, 1>, scalar_prefetch = 0 : i64, scratch_operands = 0 : i64, tpu.core_type = #tpu.core_type<tc>, window_params = [{pipeline_mode = #tpu.pipeline_mode<synchronous>, transform_indices = @transform_0, window_bounds = array<i64: 2, 4, 2>}, {transform_indices = @transform_1, window_bounds = array<i64: 2, 4, 256>}, {transform_indices = @transform_2, window_bounds = array<i64: 2, 4, 256>}]} {
    %c0 = arith.constant 0 : index
    %c0_0 = arith.constant 0 : index
    %c0_1 = arith.constant 0 : index
    %0 = vector.load %arg2[%c0, %c0_0, %c0_1] : memref<2x4x2xf32, #tpu.memory_space<vmem>>, vector<2x4x2xf32>
    %1 = vector.extract_strided_slice %0 {offsets = [0, 0, 0], sizes = [2, 4, 1], strides = [1, 1, 1]} : vector<2x4x2xf32> to vector<2x4x1xf32>
    %2 = vector.extract_strided_slice %0 {offsets = [0, 0, 1], sizes = [2, 4, 1], strides = [1, 1, 1]} : vector<2x4x2xf32> to vector<2x4x1xf32>
    %c0_2 = arith.constant 0 : index
    %c0_3 = arith.constant 0 : index
    %c0_4 = arith.constant 0 : index
    %3 = vector.load %arg3[%c0_2, %c0_3, %c0_4] : memref<2x4x256xf32, #tpu.memory_space<vmem>>, vector<2x4x256xf32>
    %cst = arith.constant dense<0.000000e+00> : vector<2x4xf32>
    %4 = vector.multi_reduction <add>, %3, %cst [2] : vector<2x4x256xf32> to vector<2x4xf32>
    %5 = vector.shape_cast %4 : vector<2x4xf32> to vector<2x4x1xf32>
    %cst_5 = arith.constant 3.906250e-03 : f32
    %6 = vector.broadcast %cst_5 : f32 to vector<2x4x1xf32>
    %7 = arith.mulf %5, %6 : vector<2x4x1xf32>
    %8 = vector.broadcast %7 : vector<2x4x1xf32> to vector<2x4x256xf32>
    %9 = arith.subf %3, %8 : vector<2x4x256xf32>
    %10 = arith.mulf %9, %9 : vector<2x4x256xf32>
    %cst_6 = arith.constant dense<0.000000e+00> : vector<2x4xf32>
    %11 = vector.multi_reduction <add>, %10, %cst_6 [2] : vector<2x4x256xf32> to vector<2x4xf32>
    %12 = vector.shape_cast %11 : vector<2x4xf32> to vector<2x4x1xf32>
    %cst_7 = arith.constant 3.906250e-03 : f32
    %13 = vector.broadcast %cst_7 : f32 to vector<2x4x1xf32>
    %14 = arith.mulf %12, %13 : vector<2x4x1xf32>
    %cst_8 = arith.constant 9.99999974E-6 : f32
    %15 = vector.broadcast %cst_8 : f32 to vector<2x4x1xf32>
    %16 = arith.addf %14, %15 : vector<2x4x1xf32>
    %17 = math.rsqrt %16 : vector<2x4x1xf32>
    %18 = arith.mulf %17, %2 : vector<2x4x1xf32>
    %19 = vector.broadcast %18 : vector<2x4x1xf32> to vector<2x4x256xf32>
    %20 = arith.mulf %9, %19 : vector<2x4x256xf32>
    %21 = vector.broadcast %1 : vector<2x4x1xf32> to vector<2x4x256xf32>
    %22 = arith.addf %20, %21 : vector<2x4x256xf32>
    %c0_9 = arith.constant 0 : index
    %c0_10 = arith.constant 0 : index
    %c0_11 = arith.constant 0 : index
    %23 = vector.load %arg4[%c0_9, %c0_10, %c0_11] : memref<2x4x256xf32, #tpu.memory_space<vmem>>, vector<2x4x256xf32>
    tpu.vector_store %arg4[%c0_9, %c0_10, %c0_11], %22 {strides = array<i32>} : memref<2x4x256xf32, #tpu.memory_space<vmem>>, vector<2x4x256xf32>,
    return
  }
  func.func @transform_0(%arg0: i32, %arg1: i32) -> (i32, i32, i32) {
    %c0_i32 = arith.constant 0 : i32
    %c0_i32_0 = arith.constant 0 : i32
    %c0_i32_1 = arith.constant 0 : i32
    %c0_i32_2 = arith.constant 0 : i32
    return %c0_i32, %c0_i32_0, %c0_i32_1 : i32, i32, i32
  }
  func.func @transform_1(%arg0: i32, %arg1: i32) -> (i32, i32, i32) {
    %c0_i32 = arith.constant 0 : i32
    %c0_i32_0 = arith.constant 0 : i32
    return %arg0, %arg1, %c0_i32 : i32, i32, i32
  }
  func.func @transform_2(%arg0: i32, %arg1: i32) -> (i32, i32, i32) {
    %c0_i32 = arith.constant 0 : i32
    %c0_i32_0 = arith.constant 0 : i32
    return %arg0, %arg1, %c0_i32 : i32, i32, i32
  }
}

</mosaic_0001>

<bundles_post_ra>
// kernel: adain_pallas.1
= control target key start
LH: loop header
LB: loop body
LE: loop exit
PB: predicated region body
PF: predicated region fallthrough
CT: control target
= control target key end

     0   :  { %vm28_vm0 = vcmask 1043456   ;;  %v162_v12 = vmov 839922192   ;;  %v163_v35 = vmov 0   ;;  %v164_v38 = vmov 1   ;;  %s224_s1 = inlined_call_operand.vmem [shape: f32[2,4,256], index: 1, kind: input, shape index: {}]   ;;  %s225_s0 = inlined_call_operand.vmem [shape: f32[2,4,2], index: 0, kind: input, shape index: {}]   ;;  %s226_s2 = inlined_call_operand.vmem [shape: f32[2,4,256], index: 2, kind: output, shape index: {}]  }
   0x1   :  { %v13_v0 = vld [vmem:[%s224_s1] sm:$0xff]  ;;  %v14_v1 = vld [vmem:[%s224_s1 + $0x8] sm:$0xff]  ;;  %v44_v13 = vunpack.c.l.s4 %v162_v12  ;;  %156 = vset.pattern.permute.xlu0 %v163_v35  ;;  %157 = vset.pattern.permute.xlu1 %v163_v35 }
   0x2   :  { %17 = vst [vmem:[#allocation1] ss:$2 sm:$0xff] %v13_v0  ;;  %v11_v36 = vld [vmem:[%s225_s0] sm:$0xf]  ;;  %v12_v37 = vld [vmem:[%s225_s0 + $0x4] sm:$0xf]  ;;  %155 = vset.pattern.permute.xlu2 %v164_v38 }
   0x3   :  { %21 = vst [vmem:[#allocation1 + $0x10] ss:$2 sm:$0xff] %v14_v1  ;;  %v190_v14 = vunpack.c.0.s8 %v44_v13 }
   0x9   :  { %v18_v2 = vld.sshfl [vmem:[#allocation1] sm:$0xff pattern:$0x75316420]  ;;  %v19_v3 = vld.sshfl [vmem:[#allocation1 + $0x8] sm:$0xff pattern:$0x75316420] }
   0xa   :  { %v29_v4 = vsel %vm28_vm0, %v18_v2, 0.0  ;;  %v30_v5 = vsel %vm28_vm0, %v19_v3, 0.0  ;;  %v22_v7 = vld.sshfl [vmem:[#allocation1 + $0x10] sm:$0xff pattern:$0x75316420] }
   0xb   :  { %v31_v6 = vadd.f32 %v30_v5, %v29_v4  ;;  %v23_v8 = vld.sshfl [vmem:[#allocation1 + $0x18] sm:$0xff pattern:$0x75316420]  ;;  %v34_v9 = vsel %vm28_vm0, %v22_v7, 0.0 }
   0xc   :  { %v35_v10 = vsel %vm28_vm0, %v23_v8, 0.0 }
   0xd   :  { %32 = vadd.xlane.f32.xlu0 %v31_v6  ;;  %v36_v11 = vadd.f32 %v35_v10, %v34_v9 }
  0x15   :  { %37 = vadd.xlane.f32.xlu0 %v36_v11 }
  0x29   :  { %128 = vperm.xlu0 %156, %v11_v36  }
  0x80   :  { %v33_v15 = vpop.xlane.xlu0 %32 }
  0x81   :  { %v39_v16 = vmul.f32 0.00390625, %v33_v15 }
  0x83   :  { %v46_v17 = vperm.slane %v39_v16, %v190_v14 }
  0x85   :  { %v193_v18 = vsub.f32 %v13_v0, %v46_v17 }
  0x87   :  { %v55_v19 = vmul.f32 %v193_v18, %v193_v18 }
  0x88   :  { %v38_v20 = vpop.xlane.xlu0 %37 }
  0x89   :  { %59 = vst [vmem:[#allocation1] ss:$2 sm:$0xff] %v55_v19  ;;  %v40_v21 = vmul.f32 0.00390625, %v38_v20 }
  0x8b   :  { %v50_v22 = vperm.slane %v40_v21, %v190_v14 }
  0x8d   :  { %v198_v23 = vsub.f32 %v14_v1, %v50_v22 }
  0x8f   :  { %v56_v24 = vmul.f32 %v198_v23, %v198_v23 }
  0x90   :  { %v60_v25 = vld.sshfl [vmem:[#allocation1] sm:$0xff pattern:$0x75316420]  ;;  %v61_v26 = vld.sshfl [vmem:[#allocation1 + $0x8] sm:$0xff pattern:$0x75316420] }
  0x91   :  { %63 = vst [vmem:[#allocation1 + $0x10] ss:$2 sm:$0xff] %v56_v24  ;;  %v70_v27 = vsel %vm28_vm0, %v60_v25, 0.0  ;;  %v71_v28 = vsel %vm28_vm0, %v61_v26, 0.0 }
  0x92   :  { %v72_v29 = vadd.f32 %v71_v28, %v70_v27 }
  0x94   :  { %73 = vadd.xlane.f32.xlu1 %v72_v29 }
  0x98   :  { %v64_v30 = vld.sshfl [vmem:[#allocation1 + $0x10] sm:$0xff pattern:$0x75316420]  ;;  %v65_v31 = vld.sshfl [vmem:[#allocation1 + $0x18] sm:$0xff pattern:$0x75316420] }
  0x99   :  { %v75_v32 = vsel %vm28_vm0, %v64_v30, 0.0  ;;  %v76_v33 = vsel %vm28_vm0, %v65_v31, 0.0 }
  0x9a   :  { %v77_v34 = vadd.f32 %v76_v33, %v75_v32 }
  0x9b   :  { %v129_v61 = vpop.permute.xlu0 %128 }
  0x9c   :  { %78 = vadd.xlane.f32.xlu1 %v77_v34  ;;  %v137_v0 = vperm.slane %v129_v61, %v190_v14 }
  0xb5   :  { %132 = vperm.xlu1 %157, %v12_v37  }
 0x107   :  { %v74_v39 = vpop.xlane.xlu1 %73 }
 0x108   :  { %v80_v40 = vmul.f32 0.00390625, %v74_v39 }
 0x10a   :  { %v82_v41 = vadd.f32 1e-05, %v80_v40 }
 0x10c   :  { %158 = vrsqrt.f32 %v82_v41  ;;  %vm90_vm2 = vweird.f32 %v82_v41 }
 0x10f   :  { %v79_v42 = vpop.xlane.xlu1 %78 }
 0x110   :  { %v81_v43 = vmul.f32 0.00390625, %v79_v42 }
 0x112   :  { %v159_v44 = vpop.eup %158  ;;  %v83_v45 = vadd.f32 1e-05, %v81_v43 }
 0x113   :  { %v85_v46 = vmul.f32 %v159_v44, %v82_v41  ;;  %vm91_vm1 = vweird.f32 %v159_v44 }
 0x114   :  { %160 = vrsqrt.f32 %v83_v45  ;;  %vm92_vm3 = vmor %vm90_vm2, %vm91_vm1  ;;  %vm100_vm5 = vweird.f32 %v83_v45 }
 0x115   :  { %v86_v47 = vmul.f32 %v159_v44, %v85_v46 }
 0x117   :  { %v87_v48 = vmul.f32 0.5, %v86_v47 }
 0x119   :  { %v88_v49 = vsub.f32 1.5, %v87_v48 }
 0x11a   :  { %v161_v50 = vpop.eup %160 }
 0x11b   :  { %v95_v51 = vmul.f32 %v161_v50, %v83_v45  ;;  %v89_v52 = vmul.f32 %v159_v44, %v88_v49  ;;  %vm101_vm4 = vweird.f32 %v161_v50 }
 0x11c   :  { %vm102_vm6 = vmor %vm100_vm5, %vm101_vm4 }
 0x11d   :  { %v96_v53 = vmul.f32 %v161_v50, %v95_v51  ;;  %v93_v54 = vsel %vm92_vm3, %v159_v44, %v89_v52 }
 0x11e   :  { %v104_v55 = vmul.f32 %v93_v54, %v11_v36 }
 0x11f   :  { %v97_v56 = vmul.f32 0.5, %v96_v53 }
 0x120   :  { %108 = vperm.xlu2 %155, %v104_v55  }
 0x121   :  { %v98_v57 = vsub.f32 1.5, %v97_v56 }
 0x123   :  { %v99_v58 = vmul.f32 %v161_v50, %v98_v57 }
 0x125   :  { %v103_v59 = vsel %vm102_vm6, %v161_v50, %v99_v58 }
 0x126   :  { %v105_v60 = vmul.f32 %v103_v59, %v12_v37 }
 0x127   :  { %v133_v3 = vpop.permute.xlu1 %132 }
 0x128   :  { %112 = vperm.xlu2 %155, %v105_v60   ;;  %v141_v6 = vperm.slane %v133_v3, %v190_v14 }
 0x17a   :  { %v109_v62 = vpop.permute.xlu2 %108 }
 0x17b   :  { %v117_v63 = vperm.slane %v109_v62, %v190_v14 }
 0x17d   :  { %v124_v1 = vmul.f32 %v117_v63, %v193_v18 }
 0x17f   :  { %v144_v2 = vadd.f32 %v137_v0, %v124_v1 }
 0x181   :  { %146 = vst [vmem:[%s226_s2] sm:$0xff] %v144_v2 }
 0x182   :  { %v113_v4 = vpop.permute.xlu2 %112 }
 0x183   :  { %v121_v5 = vperm.slane %v113_v4, %v190_v14 }
 0x185   :  { %v125_v7 = vmul.f32 %v121_v5, %v198_v23 }
 0x187   :  { %v145_v8 = vadd.f32 %v141_v6, %v125_v7 }
 0x189   :  { %147 = vst [vmem:[%s226_s2 + $0x8] sm:$0xff] %v145_v8 }

</bundles_post_ra>
